<compile_context>
chip_gen: v7x
topology: tpu7x:2x2x1
jax: 0.10.0
libtpu: 0.0.40
codegen_flags: <defaults>
</compile_context>

<pallas_src>
import jax
import jax.numpy as jnp
from jax.experimental import pallas as pl
from jax.experimental.pallas import tpu as pltpu


def temporal_attention_kernel(x_ref, w1_ref, b1_ref, w2_ref, ctx_ref, attw_ref):
    bt, T, D = x_ref.shape
    A = w1_ref.shape[1]

    x = x_ref[...]                                   # (bt, T, D)
    x2 = x.reshape(bt * T, D)                        # pure relabel (T % 8 == 0)

    # attention_score + tanh: one MXU matmul, M = bt*T rows.
    s = jnp.dot(x2, w1_ref[...], preferred_element_type=jnp.float32)   # (bt*T, A)
    s = jnp.tanh(s + b1_ref[...])                                       # (bt*T, A)

    # attention_context logits: VPU multiply + lane reduce over A, produced
    # directly in the lane-dense (bt, T) layout.  b2 omitted (cancels in softmax).
    logits = jnp.sum(s.reshape(bt, T, A) * w2_ref[...], axis=-1)        # (bt, T)

    # Numerically stable softmax over time (lane axis), deferred normalization.
    m = jnp.max(logits, axis=-1, keepdims=True)                         # (bt, 1)
    e = jnp.exp(logits - m)                                             # (bt, T)
    denom = jnp.sum(e, axis=-1, keepdims=True)                          # (bt, 1)
    inv = 1.0 / denom                                                   # exact (tiny op count)

    # Context from the unnormalized weights: single relayout back to
    # (bt, T, 1), broadcast multiply + sublane reduce, then one scale.
    ctx_un = jnp.sum(e.reshape(bt, T, 1) * x, axis=1)                   # (bt, D)

    ctx_ref[...] = (ctx_un * inv).astype(ctx_ref.dtype)                 # (bt, D)
    attw_ref[...] = (e * inv).astype(attw_ref.dtype)                    # (bt, T) lane-dense store


def _round_up(x, m):
    return (x + m - 1) // m * m


def temporal_attention(features, w1, b1, w2, b2=None, *, target_block_bytes=2 << 20):
    """features: [B, T, D] -> (context [B, D], attention_weights [B, T]).

    b2 is accepted for API parity with nn.Linear but is mathematically a
    no-op (constant logit shift cancels in softmax).
    """
    B, T, D = features.shape
    A = w1.shape[1]
    itemsize = features.dtype.itemsize
    SUB = 8

    # ---- batch tile selection (tile-size-driven, sublane-aligned blocks) ----
    row_bytes = T * D * itemsize
    row_bytes_padded = _round_up(T, SUB) * _round_up(D, 128) * itemsize
    vmem_budget = 40 << 20                                   # headroom under v7x's 64 MiB
    cap = max(1, min(target_block_bytes // row_bytes,
                     vmem_budget // (2 * row_bytes_padded)))  # double-buffered input tile

    pad_rows = 0
    if B <= cap:
        if B >= 2 * SUB and B % (2 * SUB) == 0:
            bt = B // 2            # two aligned blocks -> both TensorCores get work
        else:
            bt = B                 # single block == full batch dim (always legal)
    else:
        # bt must be a multiple of 8 (sublane-aligned output blocks).
        cap8 = max(SUB, (cap // SUB) * SUB)
        bt = 0
        d = cap8
        while d >= SUB:
            if B % d == 0:
                bt = d
                break
            d -= SUB
        if bt == 0:
            # Awkward batch (e.g. large prime): fall back to padding.  This
            # costs one extra HBM copy of `features`, so it is only used when
            # divisor-based tiling is impossible.  Padded rows are zero
            # (uniform softmax, zero context) and sliced off below.
            bt = min(cap8, _round_up(B, SUB))
            pad_rows = _round_up(B, bt) - B
            features = jnp.pad(features, ((0, pad_rows), (0, 0), (0, 0)))

    Bp = B + pad_rows
    num_blocks = Bp // bt

    b1_row = b1.reshape(1, A)
    w2_row = w2.reshape(1, A)          # (A, 1) -> (1, A) row for the VPU reduce

    # ---- scoped VMEM sizing: 2x features tile + 2x outputs + weights + slack ----
    feat_tile = bt * _round_up(T, SUB) * _round_up(D, 128) * itemsize
    out_tiles = _round_up(bt, SUB) * (_round_up(D, 128) + _round_up(T, 128)) * itemsize
    wgt_tiles = (_round_up(D, SUB) * _round_up(A, 128) + 2 * SUB * _round_up(A, 128)) * 4
    needed = 2 * feat_tile + 2 * out_tiles + 2 * wgt_tiles + (4 << 20)
    vmem_limit = int(min(64 << 20, max(needed, 32 << 20)))

    grid_spec = pltpu.PrefetchScalarGridSpec(
        num_scalar_prefetch=0,
        grid=(num_blocks,),
        in_specs=[
            pl.BlockSpec((bt, T, D), lambda i: (i, 0, 0)),   # features tile
            pl.BlockSpec((D, A), lambda i: (0, 0)),          # W1 (grid-invariant)
            pl.BlockSpec((1, A), lambda i: (0, 0)),          # b1 row (grid-invariant)
            pl.BlockSpec((1, A), lambda i: (0, 0)),          # W2 row (grid-invariant)
        ],
        out_specs=[
            pl.BlockSpec((bt, D), lambda i: (i, 0)),         # context
            pl.BlockSpec((bt, T), lambda i: (i, 0)),         # attention weights
        ],
    )

    ctx, attw = pl.pallas_call(
        temporal_attention_kernel,
        out_shape=(
            jax.ShapeDtypeStruct((Bp, D), features.dtype),
            jax.ShapeDtypeStruct((Bp, T), features.dtype),
        ),
        grid_spec=grid_spec,
        compiler_params=pltpu.CompilerParams(
            dimension_semantics=("parallel",),
            vmem_limit_bytes=vmem_limit,
        ),
    )(features, w1, b1_row, w2_row)

    if pad_rows:
        return ctx[:B], attw[:B]
    return ctx, attw


def reference(features, w1, b1, w2, b2):
    s = jnp.tanh(features @ w1 + b1)                 # [B, T, A]
    logits = (s @ w2 + b2)[..., 0]                   # [B, T]
    w = jax.nn.softmax(logits, axis=1)               # [B, T]
    ctx = jnp.einsum('bt,btd->bd', w, features)      # [B, D]
    return ctx, w


if __name__ == "__main__":
    # Keep all matmuls (kernel + reference) in true f32: TPU DEFAULT precision
    # silently runs f32 dots as bf16 MXU passes, which is what caused the
    # previous B=10 tolerance failure.
    jax.config.update("jax_default_matmul_precision", "highest")

    key = jax.random.PRNGKey(0)
    k_x, k_w1, k_b1, k_w2, k_b2, k_x2, k_x3 = jax.random.split(key, 7)

    B, T, D, A = 2, 8, 32, 16
    features = jax.random.normal(k_x, (B, T, D), dtype=jnp.float32)
    # deterministic "Linear" params (x @ W + b convention)
    w1 = jax.random.normal(k_w1, (D, A), dtype=jnp.float32) * 0.1
    b1 = jax.random.normal(k_b1, (A,), dtype=jnp.float32) * 0.1
    w2 = jax.random.normal(k_w2, (A, 1), dtype=jnp.float32) * 0.1
    b2 = jax.random.normal(k_b2, (1,), dtype=jnp.float32) * 0.1

    def check(feats, tag):
        ctx, attw = temporal_attention(feats, w1, b1, w2, b2)
        ctx = jax.block_until_ready(ctx)
        attw = jax.block_until_ready(attw)
        ctx_ref, attw_ref = reference(feats, w1, b1, w2, b2)
        assert ctx.shape == ctx_ref.shape and attw.shape == attw_ref.shape, f"shape ({tag})"
        assert jnp.allclose(ctx, ctx_ref, atol=1e-3, rtol=1e-3), f"context mismatch ({tag})"
        assert jnp.allclose(attw, attw_ref, atol=1e-3, rtol=1e-3), f"weights mismatch ({tag})"
        assert jnp.allclose(jnp.sum(attw, axis=1), 1.0, atol=1e-3), f"softmax not normalized ({tag})"

    # Single block covering the whole (tiny) batch.
    check(features, "B=2")

    # Batch that previously failed: now handled as one full-batch block (no pad).
    features2 = jax.random.normal(k_x2, (10, T, D), dtype=jnp.float32)
    check(features2, "B=10")

    # Multi-block, sublane-aligned path (two parallel blocks of 8 rows).
    features3 = jax.random.normal(k_x3, (16, T, D), dtype=jnp.float32)
    check(features3, "B=16")

    print("KERNEL_OK")
</pallas_src>

<mosaic_0001>
module attributes {stable_mosaic.version = 11 : i64} {
  func.func @temporal_attention_kernel(%arg0: i32, %arg1: memref<2x8x32xf32, #tpu.memory_space<vmem>>, %arg2: memref<32x16xf32, #tpu.memory_space<vmem>>, %arg3: memref<1x16xf32, #tpu.memory_space<vmem>>, %arg4: memref<1x16xf32, #tpu.memory_space<vmem>>, %arg5: memref<2x32xf32, #tpu.memory_space<vmem>>, %arg6: memref<2x8xf32, #tpu.memory_space<vmem>>) attributes {dimension_semantics = [#tpu.dimension_semantics<parallel>], iteration_bounds = array<i64: 1>, scalar_prefetch = 0 : i64, scratch_operands = 0 : i64, tpu.core_type = #tpu.core_type<tc>, window_params = [{transform_indices = @transform_0, window_bounds = array<i64: 2, 8, 32>}, {pipeline_mode = #tpu.pipeline_mode<synchronous>, transform_indices = @transform_1, window_bounds = array<i64: 32, 16>}, {pipeline_mode = #tpu.pipeline_mode<synchronous>, transform_indices = @transform_2, window_bounds = array<i64: 1, 16>}, {pipeline_mode = #tpu.pipeline_mode<synchronous>, transform_indices = @transform_3, window_bounds = array<i64: 1, 16>}, {transform_indices = @transform_4, window_bounds = array<i64: 2, 32>}, {transform_indices = @transform_5, window_bounds = array<i64: 2, 8>}]} {
    %c0 = arith.constant 0 : index
    %c0_0 = arith.constant 0 : index
    %c0_1 = arith.constant 0 : index
    %0 = vector.load %arg1[%c0, %c0_0, %c0_1] : memref<2x8x32xf32, #tpu.memory_space<vmem>>, vector<2x8x32xf32>
    %1 = vector.shape_cast %0 : vector<2x8x32xf32> to vector<16x32xf32>
    %c0_2 = arith.constant 0 : index
    %c0_3 = arith.constant 0 : index
    %2 = vector.load %arg2[%c0_2, %c0_3] : memref<32x16xf32, #tpu.memory_space<vmem>>, vector<32x16xf32>
    %cst = arith.constant dense<0.000000e+00> : vector<16x16xf32>
    %3 = tpu.matmul %1, %2, %cst {dimension_numbers = #tpu.dot_dimension_numbers<[1], [0], [0], [1], [0, 0, 1, 1], [], []>, precision = #tpu.contract_precision<fp32>} : vector<16x32xf32>, vector<32x16xf32>, vector<16x16xf32> -> vector<16x16xf32>
    %c0_4 = arith.constant 0 : index
    %c0_5 = arith.constant 0 : index
    %4 = vector.load %arg3[%c0_4, %c0_5] : memref<1x16xf32, #tpu.memory_space<vmem>>, vector<1x16xf32>
    %5 = vector.broadcast %4 : vector<1x16xf32> to vector<16x16xf32>
    %6 = arith.addf %3, %5 : vector<16x16xf32>
    %7 = math.tanh %6 : vector<16x16xf32>
    %8 = vector.shape_cast %7 : vector<16x16xf32> to vector<2x8x16xf32>
    %c0_6 = arith.constant 0 : index
    %c0_7 = arith.constant 0 : index
    %9 = vector.load %arg4[%c0_6, %c0_7] : memref<1x16xf32, #tpu.memory_space<vmem>>, vector<1x16xf32>
    %10 = vector.shape_cast %9 : vector<1x16xf32> to vector<1x1x16xf32>
    %11 = vector.broadcast %10 : vector<1x1x16xf32> to vector<2x8x16xf32>
    %12 = arith.mulf %8, %11 : vector<2x8x16xf32>
    %cst_8 = arith.constant dense<0.000000e+00> : vector<2x8xf32>
    %13 = vector.multi_reduction <add>, %12, %cst_8 [2] : vector<2x8x16xf32> to vector<2x8xf32>
    %cst_9 = arith.constant dense<0xFF800000> : vector<2xf32>
    %14 = vector.multi_reduction <maximumf>, %13, %cst_9 [1] : vector<2x8xf32> to vector<2xf32>
    %15 = vector.shape_cast %14 : vector<2xf32> to vector<2x1xf32>
    %16 = vector.broadcast %15 : vector<2x1xf32> to vector<2x8xf32>
    %17 = arith.subf %13, %16 : vector<2x8xf32>
    %18 = math.exp %17 : vector<2x8xf32>
    %cst_10 = arith.constant dense<0.000000e+00> : vector<2xf32>
    %19 = vector.multi_reduction <add>, %18, %cst_10 [1] : vector<2x8xf32> to vector<2xf32>
    %20 = vector.shape_cast %19 : vector<2xf32> to vector<2x1xf32>
    %cst_11 = arith.constant 1.000000e+00 : f32
    %21 = vector.broadcast %cst_11 : f32 to vector<2x1xf32>
    %22 = arith.divf %21, %20 : vector<2x1xf32>
    %23 = vector.shape_cast %18 : vector<2x8xf32> to vector<2x8x1xf32>
    %24 = vector.broadcast %23 : vector<2x8x1xf32> to vector<2x8x32xf32>
    %25 = arith.mulf %24, %0 : vector<2x8x32xf32>
    %cst_12 = arith.constant dense<0.000000e+00> : vector<2x32xf32>
    %26 = vector.multi_reduction <add>, %25, %cst_12 [1] : vector<2x8x32xf32> to vector<2x32xf32>
    %27 = vector.broadcast %22 : vector<2x1xf32> to vector<2x32xf32>
    %28 = arith.mulf %26, %27 : vector<2x32xf32>
    %c0_13 = arith.constant 0 : index
    %c0_14 = arith.constant 0 : index
    %29 = vector.load %arg5[%c0_13, %c0_14] : memref<2x32xf32, #tpu.memory_space<vmem>>, vector<2x32xf32>
    tpu.vector_store %arg5[%c0_13, %c0_14], %28 {strides = array<i32>} : memref<2x32xf32, #tpu.memory_space<vmem>>, vector<2x32xf32>,
    %30 = vector.broadcast %22 : vector<2x1xf32> to vector<2x8xf32>
    %31 = arith.mulf %18, %30 : vector<2x8xf32>
    %c0_15 = arith.constant 0 : index
    %c0_16 = arith.constant 0 : index
    %32 = vector.load %arg6[%c0_15, %c0_16] : memref<2x8xf32, #tpu.memory_space<vmem>>, vector<2x8xf32>
    tpu.vector_store %arg6[%c0_15, %c0_16], %31 {strides = array<i32>} : memref<2x8xf32, #tpu.memory_space<vmem>>, vector<2x8xf32>,
    return
  }
  func.func @transform_0(%arg0: i32) -> (i32, i32, i32) {
    %c0_i32 = arith.constant 0 : i32
    %c0_i32_0 = arith.constant 0 : i32
    %c0_i32_1 = arith.constant 0 : i32
    return %arg0, %c0_i32, %c0_i32_0 : i32, i32, i32
  }
  func.func @transform_1(%arg0: i32) -> (i32, i32) {
    %c0_i32 = arith.constant 0 : i32
    %c0_i32_0 = arith.constant 0 : i32
    %c0_i32_1 = arith.constant 0 : i32
    return %c0_i32, %c0_i32_0 : i32, i32
  }
  func.func @transform_2(%arg0: i32) -> (i32, i32) {
    %c0_i32 = arith.constant 0 : i32
    %c0_i32_0 = arith.constant 0 : i32
    %c0_i32_1 = arith.constant 0 : i32
    return %c0_i32, %c0_i32_0 : i32, i32
  }
  func.func @transform_3(%arg0: i32) -> (i32, i32) {
    %c0_i32 = arith.constant 0 : i32
    %c0_i32_0 = arith.constant 0 : i32
    %c0_i32_1 = arith.constant 0 : i32
    return %c0_i32, %c0_i32_0 : i32, i32
  }
  func.func @transform_4(%arg0: i32) -> (i32, i32) {
    %c0_i32 = arith.constant 0 : i32
    %c0_i32_0 = arith.constant 0 : i32
    return %arg0, %c0_i32 : i32, i32
  }
  func.func @transform_5(%arg0: i32) -> (i32, i32) {
    %c0_i32 = arith.constant 0 : i32
    %c0_i32_0 = arith.constant 0 : i32
    return %arg0, %c0_i32 : i32, i32
  }
}

</mosaic_0001>

<bundles_post_ra>
// kernel: tpu_custom_call.1
= control target key start
LH: loop header
LB: loop body
LE: loop exit
PB: predicated region body
PF: predicated region fallthrough
CT: control target
= control target key end

     0   :  { %11 = vsyncpa [#allocation3], 0  ;;  %vm34_vm0 = vcmask 261120   ;;  %s1083_s0 = inlined_call_operand.vmem [shape: f32[2,8,32], index: 0, kind: input, shape index: {}]   ;;  %s1084_s1 = inlined_call_operand.vmem [shape: f32[32,16], index: 1, kind: input, shape index: {}]   ;;  %s1085_s2 = inlined_call_operand.vmem [shape: f32[1,16], index: 2, kind: input, shape index: {}]   ;;  %s1086_s3 = inlined_call_operand.vmem [shape: f32[1,16], index: 3, kind: input, shape index: {}]   ;;  %s1087_s4 = inlined_call_operand.hbm [shape: f32[2,32], index: 4, kind: output, shape index: {0}]   ;;  %s1088_s5 = inlined_call_operand.hbm [shape: f32[2,8], index: 5, kind: output, shape index: {1}]  }
   0x1   :  { %v23_v0 = vld [vmem:[%s1084_s1] sm:$0xff]  ;;  %v24_v1 = vld [vmem:[%s1084_s1 + $0x8] sm:$0xff]  ;;  %v25_v2 = vld [vmem:[%s1084_s1 + $0x10] sm:$0xff] }
   0x2   :  { %v42_v3 = vand.u32 4294901760, %v23_v0  ;;  %v45_v4 = vand.u32 4294901760, %v24_v1  ;;  %v26_v5 = vld [vmem:[%s1084_s1 + $0x18] sm:$0xff]  ;;  %v48_v6 = vand.u32 4294901760, %v25_v2  ;;  %v1011_v7 = vld [vmem:[%s1083_s0] sm:$0xff]  ;;  %v1016_v8 = vld [vmem:[%s1083_s0 + $0x8] sm:$0xff] }
   0x3   :  { %v51_v9 = vand.u32 4294901760, %v26_v5  ;;  %v36_v10 = vsel %vm34_vm0, %v1011_v7, 0  ;;  %v39_v11 = vsel %vm34_vm0, %v1016_v8, 0 }
   0x4   :  { %v840_v12 = vpack.c.bf16 %v45_v4, %v42_v3  ;;  %v1022_v13 = vand.u32 4294901760, %v36_v10  ;;  %v1024_v14 = vand.u32 4294901760, %v39_v11  ;;  %v132_v15 = vsub.f32 %v23_v0, %v42_v3 }
   0x5   :  { %12 = vsyncpa [#allocation5], 0  ;;  %v844_v16 = vpack.c.bf16 %v51_v9, %v48_v6  ;;  %v139_v17 = vsub.f32 %v24_v1, %v45_v4  ;;  %v146_v18 = vsub.f32 %v25_v2, %v48_v6  ;;  %v153_v19 = vsub.f32 %v26_v5, %v51_v9  ;;  %v736_v46 = vld [vmem:[%s1085_s2] ss:$0 sm:$0xff]  ;;  %s964_s2 = smov [#allocation2]  }
   0x6   :  { %841 = vmatprep.subr.bf16.mxu1 %v840_v12  ;;  %865 = vmatprep.subr.bf16.mxu0 %v840_v12  ;;  %v111_v20 = vsub.f32 %v36_v10, %v1022_v13  ;;  %v121_v21 = vsub.f32 %v39_v11, %v1024_v14  ;;  %v133_v22 = vand.u32 4294901760, %v132_v15  ;;  %v737_v55 = vld [vmem:[%s1086_s3] ss:$0 sm:$0xff]  ;;  %vm580_vm1 = vcmask 130048   ;;  %s714_s3 = sshll.u32 %s964_s2, 4  ;;  %s715_s3 = int_to_ptr.vmem [resolvable:$true] %s714_s3 }
   0x7   :  { %843 = vmatpush3.bf16.msra.mxu1 %v840_v12  ;;  %867 = vmatpush3.bf16.msra.mxu0 %v840_v12  ;;  %v140_v23 = vand.u32 4294901760, %v139_v17  ;;  %v147_v24 = vand.u32 4294901760, %v146_v18  ;;  %v154_v25 = vand.u32 4294901760, %v153_v19  ;;  %v856_v44 = vpack.c.bf16 %v139_v17, %v132_v15  ;;  %s915_s7 = scalar_lea.vmem %s715_s3, 32  ;;  %p920_p1 = scmp.lt.s32.totalorder %s715_s3, %s715_s3 }
   0x8   :  { %845 = vmatprep.subr.bf16.mxu1 %v844_v16  ;;  %869 = vmatprep.subr.bf16.mxu0 %v844_v16  ;;  %v112_v26 = vand.u32 4294901760, %v111_v20  ;;  %v122_v27 = vand.u32 4294901760, %v121_v21  ;;  %v134_v28 = vsub.f32 %v132_v15, %v133_v22  ;;  %v860_v45 = vpack.c.bf16 %v153_v19, %v146_v18  ;;  %p916_p0 = scmp.ne.s32.totalorder %s715_s3, %s915_s7  ;;  %p921_p2 = scmp.lt.s32.totalorder %s915_s7, %s915_s7 }
   0x9   :  { %v141_v29 = vsub.f32 %v139_v17, %v140_v23  ;;  %v872_v30 = vpack.c.bf16 %v140_v23, %v133_v22  ;;  %v148_v31 = vsub.f32 %v146_v18, %v147_v24  ;;  %v155_v32 = vsub.f32 %v153_v19, %v154_v25 }
   0xa   :  { %v113_v33 = vsub.f32 %v111_v20, %v112_v26  ;;  %815 = vmatprep.mubr.f32.mxu0 %v112_v26  ;;  %v123_v34 = vsub.f32 %v121_v21, %v122_v27  ;;  %v135_v35 = vand.u32 4294901760, %v134_v28  ;;  %v876_v43 = vpack.c.bf16 %v154_v25, %v147_v24  ;;  %p922_p3 = por %p921_p2, %p920_p1 }
   0xb   :  { %847 = vmatpush3.bf16.msra.mxu1 %v844_v16  ;;  %871 = vmatpush3.bf16.msra.mxu0 %v844_v16  ;;  %v142_v36 = vand.u32 4294901760, %v141_v29  ;;  %v149_v37 = vand.u32 4294901760, %v148_v31  ;;  %v156_v38 = vand.u32 4294901760, %v155_v32  ;;  %v589_v62 = vlaneseq }
   0xc   :  { %v114_v39 = vand.u32 4294901760, %v113_v33  ;;  %v124_v40 = vand.u32 4294901760, %v123_v34  ;;  %873 = vmatprep.subr.bf16.mxu0 %v872_v30  ;;  %vm599_vm2 = vcmask 1041409   ;;  %vm602_vm3 = vcmask 58368   ;;  %p923_p4 = pnand %p922_p3, %p916_p0 }
   0xd   :  { %v848_v41 = vpack.c.bf16 %v142_v36, %v135_v35  ;;  %v852_v42 = vpack.c.bf16 %v156_v38, %v149_v37  ;;  %v590_v63 = vand.u32 127, %v589_v62  ;;  %v592_v0 = vshrl.u32 %v589_v62, 7 }
   0xe   :  { %782 = vmatprep.mubr.f32.mxu1 %v114_v39  ;;  %816 = vmatmul.mubr.f32.vlgmr.msra.gmra.mrb[0].mxu0 %v122_v27  ;;  %v963_v10 = vmov 0   ;;  %vm675_vm4 = vcmask 254976  }
   0xf   :  { %783 = vmatmul.mubr.f32.vlgmr.msra.gmra.mrb[0].mxu1 %v124_v40  ;;  %849 = vmatprep.subr.bf16.mxu1 %v848_v41  ;;  %v1040_v2 = vsub.s32 %v590_v63, %v592_v0  ;;  %v609_v11 = vsub.s32 0, %v592_v0 }
  0x10   :  { %851 = vmatpush3.bf16.msra.mxu1 %v848_v41  ;;  %875 = vmatpush3.bf16.msra.mxu0 %v872_v30 }
  0x11   :  { %853 = vmatprep.subr.bf16.mxu1 %v852_v42  ;;  %877 = vmatprep.subr.bf16.mxu0 %v876_v43 }
  0x12   :  { %793 = vmatprep.mubr.f32.mxu1 %v1022_v13  ;;  %826 = vmatprep.mubr.f32.mxu0 %v1022_v13 }
  0x13   :  { %904 = vset.pattern.permute.xlu0 %v963_v10  ;;  %903 = vset.pattern.permute.xlu1 %v963_v10 }
  0x14   :  { %855 = vmatpush3.bf16.msra.mxu1 %v852_v42  ;;  %879 = vmatpush3.bf16.msra.mxu0 %v876_v43 }
  0x15   :  { %857 = vmatprep.subr.bf16.mxu1 %v856_v44  ;;  %881 = vmatprep.subr.bf16.mxu0 %v840_v12 }
  0x17   :  { %794 = vmatmul.mubr.f32.vlgmr.msra.gmra.mrb[0].mxu1 %v1024_v14  ;;  %827 = vmatmul.mubr.f32.vlgmr.msra.gmra.mrb[0].mxu0 %v1024_v14 }
  0x18   :  { %859 = vmatpush3.bf16.msra.mxu1 %v856_v44  ;;  %883 = vmatpush3.bf16.msra.mxu0 %v840_v12  ;;  %v613_v12 = vsub.s32 1, %v592_v0 }
  0x19   :  { %861 = vmatprep.subr.bf16.mxu1 %v860_v45  ;;  %885 = vmatprep.subr.bf16.mxu0 %v844_v16 }
  0x1a   :  { %804 = vmatprep.mubr.f32.mxu1 %v111_v20  ;;  %837 = vmatprep.mubr.f32.mxu0 %v1022_v13 }
  0x1c   :  { %863 = vmatpush3.bf16.msra.mxu1 %v860_v45  ;;  %887 = vmatpush3.bf16.msra.mxu0 %v844_v16 }
  0x1f   :  { %805 = vmatmul.mubr.f32.vlgmr.msra.gmra.mrb[0].mxu1 %v121_v21  ;;  %838 = vmatmul.mubr.f32.vlgmr.msra.gmra.mrb[0].mxu0 %v1024_v14 }
  0xf2   :  { %v806_v47 = vpop.f32.mrb[0].mxu1  ;;  %v839_v48 = vpop.f32.mrb[0].mxu0 }
  0xf3   :  { %v888_v49 = vadd.f32 %v806_v47, %v736_v46  ;;  %v303_v50 = vpop.f32.mrb[1].mxu1  ;;  %v559_v51 = vpop.f32.mrb[1].mxu0 }
  0xf4   :  { %v890_v52 = vadd.f32 %v736_v46, %v303_v50 }
  0xf5   :  { %v889_v53 = vadd.f32 %v888_v49, %v839_v48 }
  0xf6   :  { %v891_v54 = vadd.f32 %v890_v52, %v559_v51 }
  0xf7   :  { %905 = vtanh.f32 %v889_v53 }
  0xf8   :  { %907 = vtanh.f32 %v891_v54 }
 0x101   :  { %v906_v56 = vpop.eup %905 }
 0x102   :  { %v908_v57 = vpop.eup %907  ;;  %v579_v60 = vmul.f32 %v906_v56, %v737_v55 }
 0x103   :  { %v578_v58 = vmul.f32 %v908_v57, %v737_v55 }
 0x104   :  { %v584_v61 = vsel %vm580_vm1, %v579_v60, 0.0 }
 0x105   :  { %v581_v59 = vsel %vm580_vm1, %v578_v58, 0.0 }
 0x106   :  { %582 = vadd.xlane.f32.xlu0 %v581_v59 }
 0x10a   :  { %585 = vadd.xlane.f32.xlu0 %v584_v61 }
 0x193   :  { %v583_v1 = vpop.xlane.xlu0 %582 }
 0x194   :  { %v594_v4 = vrot.slane %v583_v1, %v1040_v2 }
 0x197   :  { %v586_v3 = vpop.xlane.xlu0 %585 }
 0x198   :  { %v598_v5 = vrot.slane %v586_v3, %v1040_v2 }
 0x19a   :  { %v600_v6 = vsel %vm599_vm2, %v598_v5, %v594_v4 }
 0x19b   :  { %v603_v9 = vsel %vm602_vm3, %v600_v6, -inf }
 0x19c   :  { %604 = vmax.xlane.f32.xlu1 %v603_v9 }
 0x229   :  { %v605_v13 = vpop.xlane.xlu1 %604 }
 0x22a   :  { %v610_v14 = vrot.slane %v605_v13, %v609_v11  ;;  %v614_v15 = vrot.slane %v605_v13, %v613_v12 }
 0x22c   :  { %v617_v16 = vsub.f32 %v583_v1, %v610_v14  ;;  %v618_v17 = vsub.f32 %v586_v3, %v614_v15 }
 0x22e   :  { %v619_v18 = vmul.f32 1.442695, %v617_v16  ;;  %v621_v19 = vmul.f32 1.442695, %v618_v17 }
 0x230   :  { %909 = vpow2.f32 %v619_v18 }
 0x231   :  { %911 = vpow2.f32 %v621_v19 }
 0x23a   :  { %v910_v20 = vpop.eup %909 }
 0x23b   :  { %v912_v21 = vpop.eup %911  ;;  %626 = vperm.xlu1 %903, %v910_v20  }
 0x23c   :  { %629 = vperm.xlu0 %904, %v912_v21  }
 0x2ba   :  { %v627_v22 = vpop.permute.xlu1 %626 }
 0x2bb   :  { %v630_v23 = vpop.permute.xlu0 %629  ;;  %v634_v24 = vrot.slane %v627_v22, %v1040_v2  ;;  %v648_v29 = vmul.f32 %v627_v22, %v1011_v7 }
 0x2bc   :  { %v638_v25 = vrot.slane %v630_v23, %v1040_v2  ;;  %v649_v28 = vmul.f32 %v630_v23, %v1016_v8 }
 0x2bd   :  { %v650_v31 = vsel %vm34_vm0, %v648_v29, 0.0 }
 0x2be   :  { %v639_v26 = vsel %vm599_vm2, %v638_v25, %v634_v24  ;;  %v657_v30 = vsel %vm34_vm0, %v649_v28, 0.0  ;;  %v651_v33 = vrot.slane %v650_v31, 4 }
 0x2bf   :  { %v641_v27 = vsel %vm602_vm3, %v639_v26, 0.0  ;;  %v658_v32 = vrot.slane %v657_v30, 4 }
 0x2c0   :  { %642 = vadd.xlane.f32.xlu1 %v641_v27  ;;  %v652_v35 = vadd.f32 %v651_v33, %v650_v31 }
 0x2c1   :  { %v659_v34 = vadd.f32 %v658_v32, %v657_v30 }
 0x2c2   :  { %v653_v38 = vrot.slane %v652_v35, 2 }
 0x2c3   :  { %v660_v36 = vrot.slane %v659_v34, 2 }
 0x2c4   :  { %v654_v40 = vadd.f32 %v653_v38, %v652_v35 }
 0x2c5   :  { %v661_v39 = vadd.f32 %v660_v36, %v659_v34 }
 0x2c6   :  { %v655_v42 = vrot.slane %v654_v40, 1 }
 0x2c7   :  { %v662_v41 = vrot.slane %v661_v39, 1 }
 0x2c8   :  { %v656_v47 = vadd.f32 %v655_v42, %v654_v40 }
 0x2c9   :  { %v663_v44 = vadd.f32 %v662_v41, %v661_v39 }
 0x34d   :  { %v643_v37 = vpop.xlane.xlu1 %642 }
 0x34e   :  { %913 = vrcp.f32 %v643_v37 }
 0x358   :  { %v914_v43 = vpop.eup %913 }
 0x359   :  { %v680_v8 = vrot.slane %v914_v43, %v609_v11  ;;  %v665_v7 = vrot.slane %v914_v43, 1  ;;  %v684_v46 = vrot.slane %v914_v43, %v613_v12  ;;  %v668_v49 = vmul.f32 %v914_v43, %v656_v47 }
 0x35b   :  { %v687_v45 = vmul.f32 %v910_v20, %v680_v8  ;;  %v669_v48 = vmul.f32 %v665_v7, %v663_v44  ;;  %v688_v51 = vmul.f32 %v912_v21, %v684_v46 }
 0x35d   :  { %692 = vperm.xlu0 %904, %v687_v45   ;;  %v672_v50 = vrot.slane %v669_v48, 7 }
 0x35f   :  { %v673_v52 = vsel %vm599_vm2, %v672_v50, %v668_v49 }
 0x360   :  { %676 = vst.msk [vmem:[#allocation2] sm:$0x3] %vm675_vm4, %v673_v52 }
 0x361   :  { %695 = vperm.xlu0 %904, %v688_v51  }
 0x362   :  { %926 = shalt.err (!%p923_p4)
}
 0x363   :  { %s927_s10 = scalar_lea.hbm %s1087_s4, 32 }
 0x364   :  { %p928_p5 = scmp.ne.s32.totalorder %s1087_s4, %s927_s10  ;;  %p931_p6 = scmp.lt.u32.totalorder %s927_s10, %s1087_s4 }
 0x366   :  { %p933_p7 = pnand %p931_p6, %p928_p5 }
 0x368   :  { %936 = shalt.err (!%p933_p7)
}
 0x369   :  { %717 = dma.vmem_to_hbm [thread:$0]  %s715_s3, 32, %s1087_s4, [#allocation3]  }
 0x36a   :  { %s965_s17 = smov [#allocation4]  }
 0x36b   :  { %s724_s18 = sshll.u32 %s965_s17, 4  ;;  %s725_s18 = int_to_ptr.vmem [resolvable:$true] %s724_s18 }
 0x36c   :  { %s937_s19 = scalar_lea.vmem %s725_s18, 32  ;;  %p942_p9 = scmp.lt.s32.totalorder %s725_s18, %s725_s18 }
 0x36d   :  { %p938_p8 = scmp.ne.s32.totalorder %s725_s18, %s937_s19  ;;  %p943_p10 = scmp.lt.s32.totalorder %s937_s19, %s937_s19 }
 0x36f   :  { %p944_p11 = por %p943_p10, %p942_p9 }
 0x371   :  { %p945_p12 = pnand %p944_p11, %p938_p8 }
 0x3dc   :  { %v693_v53 = vpop.permute.xlu0 %692 }
 0x3dd   :  { %v700_v55 = vrot.slane %v693_v53, %v1040_v2 }
 0x3e0   :  { %v696_v54 = vpop.permute.xlu0 %695 }
 0x3e1   :  { %v704_v56 = vrot.slane %v696_v54, %v1040_v2 }
 0x3e3   :  { %v705_v57 = vsel %vm599_vm2, %v704_v56, %v700_v55 }
 0x3e4   :  { %707 = vst.msk [vmem:[#allocation4] sm:$0x3] %vm602_vm3, %v705_v57 }
 0x3e5   :  { %948 = shalt.err (!%p945_p12)
}
 0x3e6   :  { %s949_s21 = scalar_lea.hbm %s1088_s5, 32 }
 0x3e7   :  { %p950_p13 = scmp.ne.s32.totalorder %s1088_s5, %s949_s21  ;;  %p953_p0 = scmp.lt.u32.totalorder %s949_s21, %s1088_s5 }
 0x3e9   :  { %p955_p1 = pnand %p953_p0, %p950_p13 }
 0x3eb   :  { %958 = shalt.err (!%p955_p1)
}
 0x3ec   :  { %727 = dma.vmem_to_hbm [thread:$0]  %s725_s18, 32, %s1088_s5, [#allocation5]  }
 0x3ed   :  { %959 = dma.done.wait [#allocation3], 32  }
 0x3ee   :  { %960 = vsyncadd [#allocation3], 4294967264 }
 0x3ef   :  { %961 = dma.done.wait [#allocation5], 32  }
 0x3f0   :  { %962 = vsyncadd [#allocation5], 4294967264 }
 0x3f1   :  { %734 = vsyncpa [#allocation3], 1 }
 0x3f2   :  { %735 = vsyncpa [#allocation5], 1 }

</bundles_post_ra>
